<compile_context>
chip_gen: v7x
topology: tpu7x:2x2x1
jax: 0.10.0
libtpu: 0.0.40
codegen_flags: <defaults>
</compile_context>

<pallas_src>
import functools

import jax
import jax.numpy as jnp
from jax.experimental import pallas as pl
from jax.experimental.pallas import tpu as pltpu

_LANE = 128
_SUBLANE = 8
_NEG_BIG = -1e30  # padded-logit bias -> exp underflows to exactly 0


def _round_up(n, m):
    return ((n + m - 1) // m) * m


def _mlp_softmax_kernel(n_linear, *refs):
    """refs = (x_ref, w0, b0, ..., w_{L-1}, b_{L-1}, out_ref).  One batch tile."""
    x_ref = refs[0]
    out_ref = refs[-1]
    params = refs[1:-1]
    assert len(params) == 2 * n_linear

    h = x_ref[...]  # bf16 (TILE_B, P0) — already MXU-native, no per-tile cast
    z_last = None
    for i in range(n_linear):
        w = params[2 * i][...]        # bf16 (P_i, P_{i+1}), VMEM-resident
        b = params[2 * i + 1][...]    # f32  (1,  P_{i+1})
        z = jnp.dot(h, w, preferred_element_type=jnp.float32) + b  # f32 accum
        if i < n_linear - 1:
            # Plain_Net ReLU; cast fused with the ReLU keeps activations bf16.
            h = jnp.maximum(z, 0.0).astype(jnp.bfloat16)
        else:
            z_last = z                # final nn.Linear: no ReLU, keep f32

    # Softmax over the (padded) feature axis.  Padded lanes carry a -1e30 bias
    # so they contribute exactly 0 to the numerator and denominator.
    m = jnp.max(z_last, axis=-1, keepdims=True)
    e = jnp.exp(z_last - m)
    s = jnp.sum(e, axis=-1, keepdims=True)
    out_ref[...] = (e / s).astype(out_ref.dtype)   # exact normalization (free)


def _vmem_footprint(tb, P, param_bytes, single_buffered_params):
    x_bytes = 2 * tb * P[0] * 2            # double-buffered bf16 x tile
    out_bytes = 2 * tb * P[-1] * 4         # double-buffered f32 out tile
    act_bytes = 6 * tb * max(P) * 4        # f32/bf16 activation temporaries (slack)
    p_bytes = param_bytes * (1 if single_buffered_params else 2)
    return x_bytes + out_bytes + act_bytes + p_bytes + (2 << 20)


def plain_deep_forward(x, weights, biases, *, tile_b=512):
    """x: (B, d0) f32/bf16.  weights[i]: (d_i, d_{i+1}) f32 (already transposed
    from PyTorch's (out, in) layout).  biases[i]: (1, d_{i+1}) f32.
    Returns softmax(MLP(x)) of shape (B, d_last), f32."""
    n_linear = len(weights)
    B, d0 = x.shape
    dims = [d0] + [w.shape[1] for w in weights]
    out_dim = dims[-1]

    # ---- pad feature dims to lane multiples
    P = [_round_up(d, _LANE) for d in dims]

    # ---- pad / cast params once (bf16 weights = MXU-native, f32 biases)
    flat_params = []
    for i, (w, b) in enumerate(zip(weights, biases)):
        d_in, d_out = dims[i], dims[i + 1]
        w_p = jnp.zeros((P[i], P[i + 1]), jnp.bfloat16)
        w_p = w_p.at[:d_in, :d_out].set(w.astype(jnp.bfloat16))
        if i == n_linear - 1:
            b_p = jnp.full((1, P[i + 1]), _NEG_BIG, jnp.float32)
        else:
            b_p = jnp.zeros((1, P[i + 1]), jnp.float32)
        b_p = b_p.at[:, :d_out].set(b.reshape(1, d_out).astype(jnp.float32))
        flat_params.append(w_p)
        flat_params.append(b_p)
    param_bytes = sum(int(p.size) * p.dtype.itemsize for p in flat_params)

    # ---- generation-aware VMEM budget (v5e/v6e: 128 MiB, v7x: 64 MiB per TC)
    try:
        vmem_capacity = int(pltpu.get_tpu_info().vmem_capacity_bytes)
    except Exception:
        vmem_capacity = 128 << 20
    vmem_budget = max(vmem_capacity - (8 << 20), 16 << 20)

    # ---- batch tile: shrink until the resident footprint fits VMEM, then make
    #      sure there are >=2 tiles so v7x can shard them across both TCs.
    tb = min(_round_up(B, _SUBLANE), _round_up(tile_b, _SUBLANE))
    while _vmem_footprint(tb, P, param_bytes, True) > vmem_budget and tb > _SUBLANE:
        tb = _round_up(tb // 2, _SUBLANE)
    if (_round_up(B, tb) // tb) < 2 and tb > _SUBLANE:
        tb = _round_up(tb // 2, _SUBLANE)
    B_pad = _round_up(B, tb)
    grid = (B_pad // tb,)

    # ---- bf16 x: halves the only recurring per-tile HBM->VMEM DMA
    x_p = jnp.zeros((B_pad, P[0]), jnp.bfloat16).at[:B, :d0].set(
        x.astype(jnp.bfloat16))

    flops = 2 * B_pad * sum(P[i] * P[i + 1] for i in range(n_linear))
    transcendentals = B_pad * P[-1]                      # exp per logit
    bytes_accessed = int(x_p.size) * 2 + B_pad * P[-1] * 4 + param_bytes

    vmem_limit = int(min(max(_vmem_footprint(tb, P, param_bytes, False), 16 << 20),
                         vmem_budget))

    def build(single_buffer_params):
        in_specs = [pl.BlockSpec((tb, P[0]), lambda i: (i, 0))]
        for p in flat_params:
            if single_buffer_params:
                # Never re-fetched -> single buffer halves resident-param VMEM.
                spec = pl.BlockSpec(p.shape, lambda i: (0, 0),
                                    pipeline_mode=pl.Buffered(1))
            else:
                spec = pl.BlockSpec(p.shape, lambda i: (0, 0))
            in_specs.append(spec)
        out_specs = pl.BlockSpec((tb, P[-1]), lambda i: (i, 0))
        return pl.pallas_call(
            functools.partial(_mlp_softmax_kernel, n_linear),
            out_shape=jax.ShapeDtypeStruct((B_pad, P[-1]), jnp.float32),
            grid=grid,
            in_specs=in_specs,
            out_specs=out_specs,
            compiler_params=pltpu.CompilerParams(
                dimension_semantics=("parallel",),
                vmem_limit_bytes=vmem_limit),
            cost_estimate=pl.CostEstimate(
                flops=flops,
                transcendentals=transcendentals,
                bytes_accessed=bytes_accessed),
        )

    try:
        y_pad = build(True)(x_p, *flat_params)
        y_pad = jax.block_until_ready(y_pad)
    except Exception:
        # Fallback if this JAX build rejects Buffered(1) on resident params.
        y_pad = build(False)(x_p, *flat_params)

    return y_pad[:B, :out_dim]


def _reference_forward(x, weights, biases):
    """Pure-JAX reference mirroring the kernel's bf16-matmul / f32-accumulate numerics."""
    h = x.astype(jnp.bfloat16)
    z = None
    for i, (w, b) in enumerate(zip(weights, biases)):
        z = jnp.dot(h, w.astype(jnp.bfloat16),
                    preferred_element_type=jnp.float32) + b.astype(jnp.float32)
        if i < len(weights) - 1:
            h = jnp.maximum(z, 0.0).astype(jnp.bfloat16)
    return jax.nn.softmax(z, axis=-1)


def make_params(key, input_shape, output_shape, nb_layers, hidden_shape):
    """Deterministic init mimicking the layer shapes of Plain_deep.__init__."""
    dims = [input_shape] + [hidden_shape] * nb_layers + [output_shape]
    weights, biases = [], []
    for i in range(len(dims) - 1):
        d_in, d_out = dims[i], dims[i + 1]
        key, kw, kb = jax.random.split(key, 3)
        bound = 1.0 / jnp.sqrt(d_in)
        # stored directly as (d_in, d_out) == transposed PyTorch layout
        w = jax.random.uniform(kw, (d_in, d_out), jnp.float32, -bound, bound)
        b = jax.random.uniform(kb, (1, d_out), jnp.float32, -bound, bound)
        weights.append(w)
        biases.append(b)
    return weights, biases


if __name__ == "__main__":
    # Small shapes consistent with the module: an MLP on flat feature vectors.
    batch = 8
    input_shape = 16
    hidden_shape = 32
    output_shape = 8
    nb_layers = 3   # -> Plain_Net(16,32), Plain_Net(32,32), Plain_Net(32,32), Linear(32,8)

    key = jax.random.PRNGKey(0)
    key, kx = jax.random.split(key)
    x = jax.random.normal(kx, (batch, input_shape), jnp.float32)

    weights, biases = make_params(key, input_shape, output_shape,
                                  nb_layers, hidden_shape)

    y = plain_deep_forward(x, weights, biases)
    y = jax.block_until_ready(y)

    y_ref = _reference_forward(x, weights, biases)
    assert y.shape == (batch, output_shape)
    # exact divide in the epilogue -> rows sum to 1 to f32 rounding
    assert jnp.allclose(jnp.sum(y, axis=-1), 1.0, atol=1e-5)
    assert jnp.allclose(y, y_ref, atol=3e-3, rtol=3e-3)

    print("KERNEL_OK")
</pallas_src>

<mosaic_0001>
module attributes {stable_mosaic.version = 11 : i64} {
  func.func @_mlp_softmax_kernel(%arg0: i32, %arg1: memref<8x128xbf16, #tpu.memory_space<vmem>>, %arg2: memref<128x128xbf16, #tpu.memory_space<vmem>>, %arg3: memref<1x128xf32, #tpu.memory_space<vmem>>, %arg4: memref<128x128xbf16, #tpu.memory_space<vmem>>, %arg5: memref<1x128xf32, #tpu.memory_space<vmem>>, %arg6: memref<128x128xbf16, #tpu.memory_space<vmem>>, %arg7: memref<1x128xf32, #tpu.memory_space<vmem>>, %arg8: memref<128x128xbf16, #tpu.memory_space<vmem>>, %arg9: memref<1x128xf32, #tpu.memory_space<vmem>>, %arg10: memref<8x128xf32, #tpu.memory_space<vmem>>) attributes {dimension_semantics = [#tpu.dimension_semantics<parallel>], iteration_bounds = array<i64: 1>, scalar_prefetch = 0 : i64, scratch_operands = 0 : i64, tpu.core_type = #tpu.core_type<tc>, window_params = [{transform_indices = @transform_0, window_bounds = array<i64: 8, 128>}, {pipeline_mode = #tpu.pipeline_mode<synchronous>, transform_indices = @transform_1, window_bounds = array<i64: 128, 128>}, {pipeline_mode = #tpu.pipeline_mode<synchronous>, transform_indices = @transform_2, window_bounds = array<i64: 1, 128>}, {pipeline_mode = #tpu.pipeline_mode<synchronous>, transform_indices = @transform_3, window_bounds = array<i64: 128, 128>}, {pipeline_mode = #tpu.pipeline_mode<synchronous>, transform_indices = @transform_4, window_bounds = array<i64: 1, 128>}, {pipeline_mode = #tpu.pipeline_mode<synchronous>, transform_indices = @transform_5, window_bounds = array<i64: 128, 128>}, {pipeline_mode = #tpu.pipeline_mode<synchronous>, transform_indices = @transform_6, window_bounds = array<i64: 1, 128>}, {pipeline_mode = #tpu.pipeline_mode<synchronous>, transform_indices = @transform_7, window_bounds = array<i64: 128, 128>}, {pipeline_mode = #tpu.pipeline_mode<synchronous>, transform_indices = @transform_8, window_bounds = array<i64: 1, 128>}, {transform_indices = @transform_9, window_bounds = array<i64: 8, 128>}]} {
    %c0 = arith.constant 0 : index
    %c0_0 = arith.constant 0 : index
    %0 = vector.load %arg1[%c0, %c0_0] : memref<8x128xbf16, #tpu.memory_space<vmem>>, vector<8x128xbf16>
    %c0_1 = arith.constant 0 : index
    %c0_2 = arith.constant 0 : index
    %1 = vector.load %arg2[%c0_1, %c0_2] : memref<128x128xbf16, #tpu.memory_space<vmem>>, vector<128x128xbf16>
    %c0_3 = arith.constant 0 : index
    %c0_4 = arith.constant 0 : index
    %2 = vector.load %arg3[%c0_3, %c0_4] : memref<1x128xf32, #tpu.memory_space<vmem>>, vector<1x128xf32>
    %cst = arith.constant dense<0.000000e+00> : vector<8x128xf32>
    %3 = tpu.matmul %0, %1, %cst {dimension_numbers = #tpu.dot_dimension_numbers<[1], [0], [0], [1], [0, 0, 1, 1], [], []>} : vector<8x128xbf16>, vector<128x128xbf16>, vector<8x128xf32> -> vector<8x128xf32>
    %4 = vector.broadcast %2 : vector<1x128xf32> to vector<8x128xf32>
    %5 = arith.addf %3, %4 : vector<8x128xf32>
    %cst_5 = arith.constant 0.000000e+00 : f32
    %6 = vector.broadcast %cst_5 : f32 to vector<8x128xf32>
    %7 = arith.maximumf %5, %6 : vector<8x128xf32>
    %8 = arith.truncf %7 : vector<8x128xf32> to vector<8x128xbf16>
    %c0_6 = arith.constant 0 : index
    %c0_7 = arith.constant 0 : index
    %9 = vector.load %arg4[%c0_6, %c0_7] : memref<128x128xbf16, #tpu.memory_space<vmem>>, vector<128x128xbf16>
    %c0_8 = arith.constant 0 : index
    %c0_9 = arith.constant 0 : index
    %10 = vector.load %arg5[%c0_8, %c0_9] : memref<1x128xf32, #tpu.memory_space<vmem>>, vector<1x128xf32>
    %cst_10 = arith.constant dense<0.000000e+00> : vector<8x128xf32>
    %11 = tpu.matmul %8, %9, %cst_10 {dimension_numbers = #tpu.dot_dimension_numbers<[1], [0], [0], [1], [0, 0, 1, 1], [], []>} : vector<8x128xbf16>, vector<128x128xbf16>, vector<8x128xf32> -> vector<8x128xf32>
    %12 = vector.broadcast %10 : vector<1x128xf32> to vector<8x128xf32>
    %13 = arith.addf %11, %12 : vector<8x128xf32>
    %cst_11 = arith.constant 0.000000e+00 : f32
    %14 = vector.broadcast %cst_11 : f32 to vector<8x128xf32>
    %15 = arith.maximumf %13, %14 : vector<8x128xf32>
    %16 = arith.truncf %15 : vector<8x128xf32> to vector<8x128xbf16>
    %c0_12 = arith.constant 0 : index
    %c0_13 = arith.constant 0 : index
    %17 = vector.load %arg6[%c0_12, %c0_13] : memref<128x128xbf16, #tpu.memory_space<vmem>>, vector<128x128xbf16>
    %c0_14 = arith.constant 0 : index
    %c0_15 = arith.constant 0 : index
    %18 = vector.load %arg7[%c0_14, %c0_15] : memref<1x128xf32, #tpu.memory_space<vmem>>, vector<1x128xf32>
    %cst_16 = arith.constant dense<0.000000e+00> : vector<8x128xf32>
    %19 = tpu.matmul %16, %17, %cst_16 {dimension_numbers = #tpu.dot_dimension_numbers<[1], [0], [0], [1], [0, 0, 1, 1], [], []>} : vector<8x128xbf16>, vector<128x128xbf16>, vector<8x128xf32> -> vector<8x128xf32>
    %20 = vector.broadcast %18 : vector<1x128xf32> to vector<8x128xf32>
    %21 = arith.addf %19, %20 : vector<8x128xf32>
    %cst_17 = arith.constant 0.000000e+00 : f32
    %22 = vector.broadcast %cst_17 : f32 to vector<8x128xf32>
    %23 = arith.maximumf %21, %22 : vector<8x128xf32>
    %24 = arith.truncf %23 : vector<8x128xf32> to vector<8x128xbf16>
    %c0_18 = arith.constant 0 : index
    %c0_19 = arith.constant 0 : index
    %25 = vector.load %arg8[%c0_18, %c0_19] : memref<128x128xbf16, #tpu.memory_space<vmem>>, vector<128x128xbf16>
    %c0_20 = arith.constant 0 : index
    %c0_21 = arith.constant 0 : index
    %26 = vector.load %arg9[%c0_20, %c0_21] : memref<1x128xf32, #tpu.memory_space<vmem>>, vector<1x128xf32>
    %cst_22 = arith.constant dense<0.000000e+00> : vector<8x128xf32>
    %27 = tpu.matmul %24, %25, %cst_22 {dimension_numbers = #tpu.dot_dimension_numbers<[1], [0], [0], [1], [0, 0, 1, 1], [], []>} : vector<8x128xbf16>, vector<128x128xbf16>, vector<8x128xf32> -> vector<8x128xf32>
    %28 = vector.broadcast %26 : vector<1x128xf32> to vector<8x128xf32>
    %29 = arith.addf %27, %28 : vector<8x128xf32>
    %cst_23 = arith.constant dense<0xFF800000> : vector<8xf32>
    %30 = vector.multi_reduction <maximumf>, %29, %cst_23 [1] : vector<8x128xf32> to vector<8xf32>
    %31 = vector.shape_cast %30 : vector<8xf32> to vector<8x1xf32>
    %32 = vector.broadcast %31 : vector<8x1xf32> to vector<8x128xf32>
    %33 = arith.subf %29, %32 : vector<8x128xf32>
    %34 = math.exp %33 : vector<8x128xf32>
    %cst_24 = arith.constant dense<0.000000e+00> : vector<8xf32>
    %35 = vector.multi_reduction <add>, %34, %cst_24 [1] : vector<8x128xf32> to vector<8xf32>
    %36 = vector.shape_cast %35 : vector<8xf32> to vector<8x1xf32>
    %37 = vector.broadcast %36 : vector<8x1xf32> to vector<8x128xf32>
    %38 = arith.divf %34, %37 : vector<8x128xf32>
    %c0_25 = arith.constant 0 : index
    %c0_26 = arith.constant 0 : index
    %39 = vector.load %arg10[%c0_25, %c0_26] : memref<8x128xf32, #tpu.memory_space<vmem>>, vector<8x128xf32>
    tpu.vector_store %arg10[%c0_25, %c0_26], %38 {strides = array<i32>} : memref<8x128xf32, #tpu.memory_space<vmem>>, vector<8x128xf32>,
    return
  }
  func.func @transform_0(%arg0: i32) -> (i32, i32) {
    %c0_i32 = arith.constant 0 : i32
    %c0_i32_0 = arith.constant 0 : i32
    return %arg0, %c0_i32 : i32, i32
  }
  func.func @transform_1(%arg0: i32) -> (i32, i32) {
    %c0_i32 = arith.constant 0 : i32
    %c0_i32_0 = arith.constant 0 : i32
    %c0_i32_1 = arith.constant 0 : i32
    return %c0_i32, %c0_i32_0 : i32, i32
  }
  func.func @transform_2(%arg0: i32) -> (i32, i32) {
    %c0_i32 = arith.constant 0 : i32
    %c0_i32_0 = arith.constant 0 : i32
    %c0_i32_1 = arith.constant 0 : i32
    return %c0_i32, %c0_i32_0 : i32, i32
  }
  func.func @transform_3(%arg0: i32) -> (i32, i32) {
    %c0_i32 = arith.constant 0 : i32
    %c0_i32_0 = arith.constant 0 : i32
    %c0_i32_1 = arith.constant 0 : i32
    return %c0_i32, %c0_i32_0 : i32, i32
  }
  func.func @transform_4(%arg0: i32) -> (i32, i32) {
    %c0_i32 = arith.constant 0 : i32
    %c0_i32_0 = arith.constant 0 : i32
    %c0_i32_1 = arith.constant 0 : i32
    return %c0_i32, %c0_i32_0 : i32, i32
  }
  func.func @transform_5(%arg0: i32) -> (i32, i32) {
    %c0_i32 = arith.constant 0 : i32
    %c0_i32_0 = arith.constant 0 : i32
    %c0_i32_1 = arith.constant 0 : i32
    return %c0_i32, %c0_i32_0 : i32, i32
  }
  func.func @transform_6(%arg0: i32) -> (i32, i32) {
    %c0_i32 = arith.constant 0 : i32
    %c0_i32_0 = arith.constant 0 : i32
    %c0_i32_1 = arith.constant 0 : i32
    return %c0_i32, %c0_i32_0 : i32, i32
  }
  func.func @transform_7(%arg0: i32) -> (i32, i32) {
    %c0_i32 = arith.constant 0 : i32
    %c0_i32_0 = arith.constant 0 : i32
    %c0_i32_1 = arith.constant 0 : i32
    return %c0_i32, %c0_i32_0 : i32, i32
  }
  func.func @transform_8(%arg0: i32) -> (i32, i32) {
    %c0_i32 = arith.constant 0 : i32
    %c0_i32_0 = arith.constant 0 : i32
    %c0_i32_1 = arith.constant 0 : i32
    return %c0_i32, %c0_i32_0 : i32, i32
  }
  func.func @transform_9(%arg0: i32) -> (i32, i32) {
    %c0_i32 = arith.constant 0 : i32
    %c0_i32_0 = arith.constant 0 : i32
    return %arg0, %c0_i32 : i32, i32
  }
}

module attributes {stable_mosaic.version = 11 : i64} {
  func.func @_mlp_softmax_kernel(%arg0: i32, %arg1: memref<8x128xbf16, #tpu.memory_space<vmem>>, %arg2: memref<128x128xbf16, #tpu.memory_space<vmem>>, %arg3: memref<1x128xf32, #tpu.memory_space<vmem>>, %arg4: memref<128x128xbf16, #tpu.memory_space<vmem>>, %arg5: memref<1x128xf32, #tpu.memory_space<vmem>>, %arg6: memref<128x128xbf16, #tpu.memory_space<vmem>>, %arg7: memref<1x128xf32, #tpu.memory_space<vmem>>, %arg8: memref<128x128xbf16, #tpu.memory_space<vmem>>, %arg9: memref<1x128xf32, #tpu.memory_space<vmem>>, %arg10: memref<8x128xf32, #tpu.memory_space<vmem>>) attributes {dimension_semantics = [#tpu.dimension_semantics<parallel>], iteration_bounds = array<i64: 1>, scalar_prefetch = 0 : i64, scratch_operands = 0 : i64, tpu.core_type = #tpu.core_type<tc>, window_params = [{transform_indices = @transform_0, window_bounds = array<i64: 8, 128>}, {pipeline_mode = #tpu.pipeline_mode<synchronous>, transform_indices = @transform_1, window_bounds = array<i64: 128, 128>}, {pipeline_mode = #tpu.pipeline_mode<synchronous>, transform_indices = @transform_2, window_bounds = array<i64: 1, 128>}, {pipeline_mode = #tpu.pipeline_mode<synchronous>, transform_indices = @transform_3, window_bounds = array<i64: 128, 128>}, {pipeline_mode = #tpu.pipeline_mode<synchronous>, transform_indices = @transform_4, window_bounds = array<i64: 1, 128>}, {pipeline_mode = #tpu.pipeline_mode<synchronous>, transform_indices = @transform_5, window_bounds = array<i64: 128, 128>}, {pipeline_mode = #tpu.pipeline_mode<synchronous>, transform_indices = @transform_6, window_bounds = array<i64: 1, 128>}, {pipeline_mode = #tpu.pipeline_mode<synchronous>, transform_indices = @transform_7, window_bounds = array<i64: 128, 128>}, {pipeline_mode = #tpu.pipeline_mode<synchronous>, transform_indices = @transform_8, window_bounds = array<i64: 1, 128>}, {transform_indices = @transform_9, window_bounds = array<i64: 8, 128>}]} {
    %c0 = arith.constant 0 : index
    %c0_0 = arith.constant 0 : index
    %0 = vector.load %arg1[%c0, %c0_0] : memref<8x128xbf16, #tpu.memory_space<vmem>>, vector<8x128xbf16>
    %c0_1 = arith.constant 0 : index
    %c0_2 = arith.constant 0 : index
    %1 = vector.load %arg2[%c0_1, %c0_2] : memref<128x128xbf16, #tpu.memory_space<vmem>>, vector<128x128xbf16>
    %c0_3 = arith.constant 0 : index
    %c0_4 = arith.constant 0 : index
    %2 = vector.load %arg3[%c0_3, %c0_4] : memref<1x128xf32, #tpu.memory_space<vmem>>, vector<1x128xf32>
    %cst = arith.constant dense<0.000000e+00> : vector<8x128xf32>
    %3 = tpu.matmul %0, %1, %cst {dimension_numbers = #tpu.dot_dimension_numbers<[1], [0], [0], [1], [0, 0, 1, 1], [], []>} : vector<8x128xbf16>, vector<128x128xbf16>, vector<8x128xf32> -> vector<8x128xf32>
    %4 = vector.broadcast %2 : vector<1x128xf32> to vector<8x128xf32>
    %5 = arith.addf %3, %4 : vector<8x128xf32>
    %cst_5 = arith.constant 0.000000e+00 : f32
    %6 = vector.broadcast %cst_5 : f32 to vector<8x128xf32>
    %7 = arith.maximumf %5, %6 : vector<8x128xf32>
    %8 = arith.truncf %7 : vector<8x128xf32> to vector<8x128xbf16>
    %c0_6 = arith.constant 0 : index
    %c0_7 = arith.constant 0 : index
    %9 = vector.load %arg4[%c0_6, %c0_7] : memref<128x128xbf16, #tpu.memory_space<vmem>>, vector<128x128xbf16>
    %c0_8 = arith.constant 0 : index
    %c0_9 = arith.constant 0 : index
    %10 = vector.load %arg5[%c0_8, %c0_9] : memref<1x128xf32, #tpu.memory_space<vmem>>, vector<1x128xf32>
    %cst_10 = arith.constant dense<0.000000e+00> : vector<8x128xf32>
    %11 = tpu.matmul %8, %9, %cst_10 {dimension_numbers = #tpu.dot_dimension_numbers<[1], [0], [0], [1], [0, 0, 1, 1], [], []>} : vector<8x128xbf16>, vector<128x128xbf16>, vector<8x128xf32> -> vector<8x128xf32>
    %12 = vector.broadcast %10 : vector<1x128xf32> to vector<8x128xf32>
    %13 = arith.addf %11, %12 : vector<8x128xf32>
    %cst_11 = arith.constant 0.000000e+00 : f32
    %14 = vector.broadcast %cst_11 : f32 to vector<8x128xf32>
    %15 = arith.maximumf %13, %14 : vector<8x128xf32>
    %16 = arith.truncf %15 : vector<8x128xf32> to vector<8x128xbf16>
    %c0_12 = arith.constant 0 : index
    %c0_13 = arith.constant 0 : index
    %17 = vector.load %arg6[%c0_12, %c0_13] : memref<128x128xbf16, #tpu.memory_space<vmem>>, vector<128x128xbf16>
    %c0_14 = arith.constant 0 : index
    %c0_15 = arith.constant 0 : index
    %18 = vector.load %arg7[%c0_14, %c0_15] : memref<1x128xf32, #tpu.memory_space<vmem>>, vector<1x128xf32>
    %cst_16 = arith.constant dense<0.000000e+00> : vector<8x128xf32>
    %19 = tpu.matmul %16, %17, %cst_16 {dimension_numbers = #tpu.dot_dimension_numbers<[1], [0], [0], [1], [0, 0, 1, 1], [], []>} : vector<8x128xbf16>, vector<128x128xbf16>, vector<8x128xf32> -> vector<8x128xf32>
    %20 = vector.broadcast %18 : vector<1x128xf32> to vector<8x128xf32>
    %21 = arith.addf %19, %20 : vector<8x128xf32>
    %cst_17 = arith.constant 0.000000e+00 : f32
    %22 = vector.broadcast %cst_17 : f32 to vector<8x128xf32>
    %23 = arith.maximumf %21, %22 : vector<8x128xf32>
    %24 = arith.truncf %23 : vector<8x128xf32> to vector<8x128xbf16>
    %c0_18 = arith.constant 0 : index
    %c0_19 = arith.constant 0 : index
    %25 = vector.load %arg8[%c0_18, %c0_19] : memref<128x128xbf16, #tpu.memory_space<vmem>>, vector<128x128xbf16>
    %c0_20 = arith.constant 0 : index
    %c0_21 = arith.constant 0 : index
    %26 = vector.load %arg9[%c0_20, %c0_21] : memref<1x128xf32, #tpu.memory_space<vmem>>, vector<1x128xf32>
    %cst_22 = arith.constant dense<0.000000e+00> : vector<8x128xf32>
    %27 = tpu.matmul %24, %25, %cst_22 {dimension_numbers = #tpu.dot_dimension_numbers<[1], [0], [0], [1], [0, 0, 1, 1], [], []>} : vector<8x128xbf16>, vector<128x128xbf16>, vector<8x128xf32> -> vector<8x128xf32>
    %28 = vector.broadcast %26 : vector<1x128xf32> to vector<8x128xf32>
    %29 = arith.addf %27, %28 : vector<8x128xf32>
    %cst_23 = arith.constant dense<0xFF800000> : vector<8xf32>
    %30 = vector.multi_reduction <maximumf>, %29, %cst_23 [1] : vector<8x128xf32> to vector<8xf32>
    %31 = vector.shape_cast %30 : vector<8xf32> to vector<8x1xf32>
    %32 = vector.broadcast %31 : vector<8x1xf32> to vector<8x128xf32>
    %33 = arith.subf %29, %32 : vector<8x128xf32>
    %34 = math.exp %33 : vector<8x128xf32>
    %cst_24 = arith.constant dense<0.000000e+00> : vector<8xf32>
    %35 = vector.multi_reduction <add>, %34, %cst_24 [1] : vector<8x128xf32> to vector<8xf32>
    %36 = vector.shape_cast %35 : vector<8xf32> to vector<8x1xf32>
    %37 = vector.broadcast %36 : vector<8x1xf32> to vector<8x128xf32>
    %38 = arith.divf %34, %37 : vector<8x128xf32>
    %c0_25 = arith.constant 0 : index
    %c0_26 = arith.constant 0 : index
    %39 = vector.load %arg10[%c0_25, %c0_26] : memref<8x128xf32, #tpu.memory_space<vmem>>, vector<8x128xf32>
    tpu.vector_store %arg10[%c0_25, %c0_26], %38 {strides = array<i32>} : memref<8x128xf32, #tpu.memory_space<vmem>>, vector<8x128xf32>,
    return
  }
  func.func @transform_0(%arg0: i32) -> (i32, i32) {
    %c0_i32 = arith.constant 0 : i32
    %c0_i32_0 = arith.constant 0 : i32
    return %arg0, %c0_i32 : i32, i32
  }
  func.func @transform_1(%arg0: i32) -> (i32, i32) {
    %c0_i32 = arith.constant 0 : i32
    %c0_i32_0 = arith.constant 0 : i32
    %c0_i32_1 = arith.constant 0 : i32
    return %c0_i32, %c0_i32_0 : i32, i32
  }
  func.func @transform_2(%arg0: i32) -> (i32, i32) {
    %c0_i32 = arith.constant 0 : i32
    %c0_i32_0 = arith.constant 0 : i32
    %c0_i32_1 = arith.constant 0 : i32
    return %c0_i32, %c0_i32_0 : i32, i32
  }
  func.func @transform_3(%arg0: i32) -> (i32, i32) {
    %c0_i32 = arith.constant 0 : i32
    %c0_i32_0 = arith.constant 0 : i32
    %c0_i32_1 = arith.constant 0 : i32
    return %c0_i32, %c0_i32_0 : i32, i32
  }
  func.func @transform_4(%arg0: i32) -> (i32, i32) {
    %c0_i32 = arith.constant 0 : i32
    %c0_i32_0 = arith.constant 0 : i32
    %c0_i32_1 = arith.constant 0 : i32
    return %c0_i32, %c0_i32_0 : i32, i32
  }
  func.func @transform_5(%arg0: i32) -> (i32, i32) {
    %c0_i32 = arith.constant 0 : i32
    %c0_i32_0 = arith.constant 0 : i32
    %c0_i32_1 = arith.constant 0 : i32
    return %c0_i32, %c0_i32_0 : i32, i32
  }
  func.func @transform_6(%arg0: i32) -> (i32, i32) {
    %c0_i32 = arith.constant 0 : i32
    %c0_i32_0 = arith.constant 0 : i32
    %c0_i32_1 = arith.constant 0 : i32
    return %c0_i32, %c0_i32_0 : i32, i32
  }
  func.func @transform_7(%arg0: i32) -> (i32, i32) {
    %c0_i32 = arith.constant 0 : i32
    %c0_i32_0 = arith.constant 0 : i32
    %c0_i32_1 = arith.constant 0 : i32
    return %c0_i32, %c0_i32_0 : i32, i32
  }
  func.func @transform_8(%arg0: i32) -> (i32, i32) {
    %c0_i32 = arith.constant 0 : i32
    %c0_i32_0 = arith.constant 0 : i32
    %c0_i32_1 = arith.constant 0 : i32
    return %c0_i32, %c0_i32_0 : i32, i32
  }
  func.func @transform_9(%arg0: i32) -> (i32, i32) {
    %c0_i32 = arith.constant 0 : i32
    %c0_i32_0 = arith.constant 0 : i32
    return %arg0, %c0_i32 : i32, i32
  }
}

</mosaic_0001>

<bundles_post_ra>
// kernel: tpu_custom_call.1
= control target key start
LH: loop header
LB: loop body
LE: loop exit
PB: predicated region body
PF: predicated region fallthrough
CT: control target
= control target key end

     0   :  { %14 = vsyncpa [#allocation3], 0  ;;  %s1112_s0 = inlined_call_operand.hbm [shape: bf16[8,128], index: 0, kind: input, shape index: {}]   ;;  %s1113_s1 = inlined_call_operand.hbm [shape: bf16[128,128], index: 1, kind: input, shape index: {}]   ;;  %s1114_s2 = inlined_call_operand.vmem [shape: f32[1,128], index: 2, kind: input, shape index: {}]   ;;  %s1115_s3 = inlined_call_operand.hbm [shape: bf16[128,128], index: 3, kind: input, shape index: {}]   ;;  %s1116_s4 = inlined_call_operand.vmem [shape: f32[1,128], index: 4, kind: input, shape index: {}]   ;;  %s1117_s5 = inlined_call_operand.hbm [shape: bf16[128,128], index: 5, kind: input, shape index: {}]   ;;  %s1118_s6 = inlined_call_operand.vmem [shape: f32[1,128], index: 6, kind: input, shape index: {}]   ;;  %s1119_s7 = inlined_call_operand.hbm [shape: bf16[128,128], index: 7, kind: input, shape index: {}]   ;;  %s1120_s8 = inlined_call_operand.vmem [shape: f32[1,128], index: 8, kind: input, shape index: {}]   ;;  %s1121_s9 = inlined_call_operand.hbm [shape: f32[8,128], index: 9, kind: output, shape index: {}]  }
   0x1   :  { %15 = vsyncpa [#allocation6], 0 }
   0x2   :  { %16 = vsyncpa [#allocation9], 0 }
   0x3   :  { %17 = vsyncpa [#allocation4], 0  ;;  %s916_s30 = smov [#allocation5]   ;;  %s776_s13 = scalar_lea.hbm %s1113_s1, 1024 }
   0x4   :  { %s33_s10 = sshll.u32 %s916_s30, 4  ;;  %p777_p0 = scmp.ne.s32.totalorder %s1113_s1, %s776_s13  ;;  %s34_s10 = int_to_ptr.vmem [resolvable:$true] %s33_s10 }
   0x5   :  { %p780_p1 = scmp.lt.u32.totalorder %s776_s13, %s1113_s1 }
   0x7   :  { %p782_p2 = pnand %p780_p1, %p777_p0 }
   0x9   :  { %785 = shalt.err (!%p782_p2)
}
   0xa   :  { %s786_s18 = scalar_lea.vmem %s34_s10, 1024  ;;  %p791_p4 = scmp.lt.s32.totalorder %s34_s10, %s34_s10 }
   0xb   :  { %p787_p3 = scmp.ne.s32.totalorder %s34_s10, %s786_s18  ;;  %p792_p5 = scmp.lt.s32.totalorder %s786_s18, %s786_s18 }
   0xd   :  { %p793_p6 = por %p792_p5, %p791_p4 }
   0xf   :  { %p794_p7 = pnand %p793_p6, %p787_p3 }
  0x11   :  { %797 = shalt.err (!%p794_p7)
}
  0x12   :  { %s917_s19 = smov 64   ;;  %s918_s20 = smov 4  }
  0x13   :  { %39 = dma.hbm_to_vmem [thread:$0]  %s1113_s1, 1024, %s34_s10, [#allocation6], %s917_s19, %s917_s19, %s918_s20  }
  0x14   :  { %s919_s23 = smov [#allocation8]   ;;  %s920_s25 = smov [#allocation2]  }
  0x15   :  { %s61_s24 = sshll.u32 %s919_s23, 4  ;;  %s24_s26 = sshll.u32 %s920_s25, 4  ;;  %s62_s24 = int_to_ptr.vmem [resolvable:$true] %s61_s24  ;;  %s25_s26 = int_to_ptr.vmem [resolvable:$true] %s24_s26 }
  0x16   :  { %s798_s29 = scalar_lea.hbm %s1117_s5, 1024 }
  0x17   :  { %p799_p8 = scmp.ne.s32.totalorder %s1117_s5, %s798_s29  ;;  %p802_p9 = scmp.lt.u32.totalorder %s798_s29, %s1117_s5 }
  0x19   :  { %p804_p10 = pnand %p802_p9, %p799_p8 }
  0x1b   :  { %807 = shalt.err (!%p804_p10)
}
  0x1c   :  { %s808_s1 = scalar_lea.vmem %s62_s24, 1024  ;;  %p813_p12 = scmp.lt.s32.totalorder %s62_s24, %s62_s24 }
  0x1d   :  { %p809_p11 = scmp.ne.s32.totalorder %s62_s24, %s808_s1  ;;  %p814_p13 = scmp.lt.s32.totalorder %s808_s1, %s808_s1 }
  0x1f   :  { %p815_p0 = por %p814_p13, %p813_p12 }
  0x21   :  { %p816_p1 = pnand %p815_p0, %p809_p11 }
  0x23   :  { %819 = shalt.err (!%p816_p1)
}
  0x24   :  { %67 = dma.hbm_to_vmem [thread:$0]  %s1117_s5, 1024, %s62_s24, [#allocation9], %s917_s19, %s917_s19, %s918_s20  }
  0x25   :  { %s820_s17 = scalar_lea.hbm %s1112_s0, 64 }
  0x26   :  { %p821_p2 = scmp.ne.s32.totalorder %s1112_s0, %s820_s17  ;;  %p824_p3 = scmp.lt.u32.totalorder %s820_s17, %s1112_s0 }
  0x28   :  { %p826_p4 = pnand %p824_p3, %p821_p2 }
  0x2a   :  { %829 = shalt.err (!%p826_p4)
}
  0x2b   :  { %s830_s25 = scalar_lea.vmem %s25_s26, 64  ;;  %p835_p6 = scmp.lt.s32.totalorder %s25_s26, %s25_s26 }
  0x2c   :  { %p831_p5 = scmp.ne.s32.totalorder %s25_s26, %s830_s25  ;;  %p836_p7 = scmp.lt.s32.totalorder %s830_s25, %s830_s25 }
  0x2e   :  { %p837_p8 = por %p836_p7, %p835_p6 }
  0x30   :  { %p838_p9 = pnand %p837_p8, %p831_p5 }
  0x32   :  { %841 = shalt.err (!%p838_p9)
}
  0x33   :  { %27 = dma.hbm_to_vmem [thread:$0]  %s1112_s0, 64, %s25_s26, [#allocation3]  }
  0x34   :  { %s921_s27 = smov [#allocation7]   ;;  %s922_s29 = smov [#allocation10]  }
  0x35   :  { %s47_s28 = sshll.u32 %s921_s27, 4  ;;  %s75_s30 = sshll.u32 %s922_s29, 4  ;;  %s48_s28 = int_to_ptr.vmem [resolvable:$true] %s47_s28  ;;  %s76_s30 = int_to_ptr.vmem [resolvable:$true] %s75_s30 }
  0x36   :  { %s842_s13 = scalar_lea.hbm %s1115_s3, 1024 }
  0x37   :  { %p843_p10 = scmp.ne.s32.totalorder %s1115_s3, %s842_s13  ;;  %p846_p11 = scmp.lt.u32.totalorder %s842_s13, %s1115_s3 }
  0x39   :  { %p848_p12 = pnand %p846_p11, %p843_p10 }
  0x3b   :  { %851 = shalt.err (!%p848_p12)
}
  0x3c   :  { %s852_s0 = scalar_lea.vmem %s48_s28, 1024  ;;  %p857_p0 = scmp.lt.s32.totalorder %s48_s28, %s48_s28 }
  0x3d   :  { %p853_p13 = scmp.ne.s32.totalorder %s48_s28, %s852_s0  ;;  %p858_p1 = scmp.lt.s32.totalorder %s852_s0, %s852_s0 }
  0x3f   :  { %p859_p2 = por %p858_p1, %p857_p0 }
  0x41   :  { %p860_p3 = pnand %p859_p2, %p853_p13 }
  0x43   :  { %863 = shalt.err (!%p860_p3)
}
  0x44   :  { %53 = dma.hbm_to_vmem [thread:$0]  %s1115_s3, 1024, %s48_s28, [#allocation6], %s917_s19, %s917_s19, %s918_s20  }
  0x45   :  { %s864_s21 = scalar_lea.hbm %s1119_s7, 1024 }
  0x46   :  { %p865_p4 = scmp.ne.s32.totalorder %s1119_s7, %s864_s21  ;;  %p868_p5 = scmp.lt.u32.totalorder %s864_s21, %s1119_s7 }
  0x48   :  { %p870_p6 = pnand %p868_p5, %p865_p4 }
  0x4a   :  { %873 = shalt.err (!%p870_p6)
}
  0x4b   :  { %s874_s24 = scalar_lea.vmem %s76_s30, 1024  ;;  %p879_p8 = scmp.lt.s32.totalorder %s76_s30, %s76_s30 }
  0x4c   :  { %p875_p7 = scmp.ne.s32.totalorder %s76_s30, %s874_s24  ;;  %p880_p9 = scmp.lt.s32.totalorder %s874_s24, %s874_s24 }
  0x4e   :  { %p881_p10 = por %p880_p9, %p879_p8 }
  0x50   :  { %p882_p11 = pnand %p881_p10, %p875_p7 }
  0x52   :  { %885 = shalt.err (!%p882_p11)
}
  0x53   :  { %81 = dma.hbm_to_vmem [thread:$0]  %s1119_s7, 1024, %s76_s30, [#allocation9], %s917_s19, %s917_s19, %s918_s20  }
  0x54   :  { %908 = dma.done.wait [#allocation3], 64  }
  0x55   :  { %909 = vsyncadd [#allocation3], 4294967232 }
  0x56   :  { %910 = dma.done.wait [#allocation6], 2048  }
  0x57   :  { %911 = vsyncadd [#allocation6], 4294965248 }
  0x58   :  { %912 = dma.done.wait [#allocation9], 2048  }
  0x59   :  { %913 = vsyncadd [#allocation9], 4294965248  ;;  %v923_v0 = vmov 0.0   ;;  %vm924_vm0 = vmmov 0   ;;  %v740_v1 = vld [vmem:[#allocation5] sm:$0xff]   ;;  %v741_v2 = vld [vmem:[#allocation5 + $0x8] sm:$0xff]  }
  0x5a   :  { %650 = vmatprep.subr.bf16.mxu0 %v923_v0  ;;  %666 = vmatprep.mubr.msk.bf16.mxu0 %vm924_vm0, %v923_v0  ;;  %v742_v3 = vld [vmem:[#allocation5 + $0x10] sm:$0xff]   ;;  %v748_v4 = vld [vmem:[#allocation7] sm:$0xff]   ;;  %v743_v5 = vld [vmem:[#allocation5 + $0x18] sm:$0xff]  }
  0x5b   :  { %670 = vmatprep.subr.bf16.mxu1 %v923_v0  ;;  %686 = vmatprep.mubr.msk.bf16.mxu1 %vm924_vm0, %v923_v0  ;;  %v749_v6 = vld [vmem:[#allocation7 + $0x8] sm:$0xff]   ;;  %v744_v7 = vld [vmem:[#allocation5 + $0x20] sm:$0xff]   ;;  %v750_v8 = vld [vmem:[#allocation7 + $0x10] sm:$0xff]  }
  0x5c   :  { %651 = vmatpush3.bf16.msra.mxu0 %v740_v1  ;;  %671 = vmatpush3.bf16.msra.mxu1 %v748_v4  ;;  %v745_v9 = vld [vmem:[#allocation5 + $0x28] sm:$0xff]   ;;  %v751_v10 = vld [vmem:[#allocation7 + $0x18] sm:$0xff]   ;;  %v746_v11 = vld [vmem:[#allocation5 + $0x30] sm:$0xff]  }
  0x5d   :  { %652 = vmatprep.subr.bf16.mxu0 %v923_v0  ;;  %672 = vmatprep.subr.bf16.mxu1 %v923_v0  ;;  %v752_v12 = vld [vmem:[#allocation7 + $0x20] sm:$0xff]   ;;  %v747_v13 = vld [vmem:[#allocation5 + $0x38] sm:$0xff]   ;;  %v753_v14 = vld [vmem:[#allocation7 + $0x28] sm:$0xff]  }
  0x5e   :  { %v100_v15 = vld [vmem:[#allocation2] sm:$0xf]  ;;  %v754_v16 = vld [vmem:[#allocation7 + $0x30] sm:$0xff]   ;;  %v756_v18 = vld [vmem:[#allocation8] sm:$0xff]  }
  0x5f   :  { %v755_v17 = vld [vmem:[#allocation7 + $0x38] sm:$0xff]   ;;  %v757_v19 = vld [vmem:[#allocation8 + $0x8] sm:$0xff]   ;;  %v758_v20 = vld [vmem:[#allocation8 + $0x10] sm:$0xff]  }
  0x60   :  { %653 = vmatpush3.bf16.msra.mxu0 %v741_v2  ;;  %673 = vmatpush3.bf16.msra.mxu1 %v749_v6  ;;  %v759_v21 = vld [vmem:[#allocation8 + $0x18] sm:$0xff]   ;;  %v760_v22 = vld [vmem:[#allocation8 + $0x20] sm:$0xff]   ;;  %v761_v23 = vld [vmem:[#allocation8 + $0x28] sm:$0xff]  }
  0x61   :  { %654 = vmatprep.subr.bf16.mxu0 %v923_v0  ;;  %674 = vmatprep.subr.bf16.mxu1 %v923_v0  ;;  %v578_v24 = vld [vmem:[%s1114_s2] ss:$0 sm:$0xff]  ;;  %v762_v32 = vld [vmem:[#allocation8 + $0x30] sm:$0xff]   ;;  %v764_v34 = vld [vmem:[#allocation10] sm:$0xff]  }
  0x62   :  { %v763_v33 = vld [vmem:[#allocation8 + $0x38] sm:$0xff]   ;;  %v765_v35 = vld [vmem:[#allocation10 + $0x8] sm:$0xff]   ;;  %v766_v36 = vld [vmem:[#allocation10 + $0x10] sm:$0xff]  }
  0x63   :  { %v767_v37 = vld [vmem:[#allocation10 + $0x18] sm:$0xff]   ;;  %v768_v38 = vld [vmem:[#allocation10 + $0x20] sm:$0xff]   ;;  %v769_v39 = vld [vmem:[#allocation10 + $0x28] sm:$0xff]  }
  0x64   :  { %655 = vmatpush3.bf16.msra.mxu0 %v742_v3  ;;  %675 = vmatpush3.bf16.msra.mxu1 %v750_v8  ;;  %v587_v40 = vld [vmem:[%s1116_s4] ss:$0 sm:$0xff]  ;;  %v770_v48 = vld [vmem:[#allocation10 + $0x30] sm:$0xff]  }
  0x65   :  { %656 = vmatprep.subr.bf16.mxu0 %v923_v0  ;;  %676 = vmatprep.subr.bf16.mxu1 %v923_v0  ;;  %v771_v49 = vld [vmem:[#allocation10 + $0x38] sm:$0xff]  }
  0x66   :  { %v596_v50 = vld [vmem:[%s1118_s6] ss:$0 sm:$0xff]  ;;  %s925_s6 = smov [#allocation11]  }
  0x67   :  { %v605_v58 = vld [vmem:[%s1120_s8] ss:$0 sm:$0xff]  ;;  %s567_s11 = sshll.u32 %s925_s6, 4  ;;  %s568_s11 = int_to_ptr.vmem [resolvable:$true] %s567_s11 }
  0x68   :  { %657 = vmatpush3.bf16.msra.mxu0 %v743_v5  ;;  %677 = vmatpush3.bf16.msra.mxu1 %v751_v10  ;;  %s886_s8 = scalar_lea.vmem %s568_s11, 128  ;;  %p891_p13 = scmp.lt.s32.totalorder %s568_s11, %s568_s11 }
  0x69   :  { %658 = vmatprep.subr.bf16.mxu0 %v923_v0  ;;  %678 = vmatprep.subr.bf16.mxu1 %v923_v0  ;;  %p887_p12 = scmp.ne.s32.totalorder %s568_s11, %s886_s8  ;;  %p892_p0 = scmp.lt.s32.totalorder %s886_s8, %s886_s8 }
  0x6b   :  { %p893_p1 = por %p892_p0, %p891_p13 }
  0x6c   :  { %659 = vmatpush3.bf16.msra.mxu0 %v744_v7  ;;  %679 = vmatpush3.bf16.msra.mxu1 %v752_v12 }
  0x6d   :  { %660 = vmatprep.subr.bf16.mxu0 %v923_v0  ;;  %680 = vmatprep.subr.bf16.mxu1 %v923_v0  ;;  %p894_p2 = pnand %p893_p1, %p887_p12 }
  0x70   :  { %661 = vmatpush3.bf16.msra.mxu0 %v745_v9  ;;  %681 = vmatpush3.bf16.msra.mxu1 %v753_v14 }
  0x71   :  { %662 = vmatprep.subr.bf16.mxu0 %v923_v0  ;;  %682 = vmatprep.subr.bf16.mxu1 %v923_v0 }
  0x74   :  { %663 = vmatpush3.bf16.msra.mxu0 %v746_v11  ;;  %683 = vmatpush3.bf16.msra.mxu1 %v754_v16 }
  0x75   :  { %664 = vmatprep.subr.bf16.mxu0 %v923_v0  ;;  %684 = vmatprep.subr.bf16.mxu1 %v923_v0 }
  0x78   :  { %665 = vmatpush3.bf16.msra.mxu0 %v747_v13  ;;  %685 = vmatpush3.bf16.msra.mxu1 %v755_v17 }
  0x79   :  { %690 = vmatprep.subr.bf16.mxu0 %v923_v0  ;;  %710 = vmatprep.subr.bf16.mxu1 %v923_v0 }
  0x7b   :  { %667 = vmatmul.mubr.bf16.vlgmr.msra.gmra.mrb[0].mxu0 %v100_v15 }
  0x7c   :  { %706 = vmatprep.mubr.msk.bf16.mxu0 %vm924_vm0, %v923_v0  ;;  %691 = vmatpush3.bf16.msra.mxu0 %v756_v18 }
  0x7d   :  { %692 = vmatprep.subr.bf16.mxu0 %v923_v0 }
  0x80   :  { %693 = vmatpush3.bf16.msra.mxu0 %v757_v19 }
  0x81   :  { %694 = vmatprep.subr.bf16.mxu0 %v923_v0 }
  0x84   :  { %695 = vmatpush3.bf16.msra.mxu0 %v758_v20 }
  0x85   :  { %696 = vmatprep.subr.bf16.mxu0 %v923_v0 }
  0x88   :  { %697 = vmatpush3.bf16.msra.mxu0 %v759_v21 }
  0x89   :  { %698 = vmatprep.subr.bf16.mxu0 %v923_v0 }
  0x8c   :  { %699 = vmatpush3.bf16.msra.mxu0 %v760_v22 }
  0x8d   :  { %700 = vmatprep.subr.bf16.mxu0 %v923_v0 }
  0x90   :  { %701 = vmatpush3.bf16.msra.mxu0 %v761_v23 }
  0x91   :  { %702 = vmatprep.subr.bf16.mxu0 %v923_v0 }
  0x94   :  { %703 = vmatpush3.bf16.msra.mxu0 %v762_v32 }
  0x95   :  { %704 = vmatprep.subr.bf16.mxu0 %v923_v0 }
  0x98   :  { %705 = vmatpush3.bf16.msra.mxu0 %v763_v33 }
 0x14e   :  { %v206_v25 = vpop.f32.mrb[0].mxu0 }
 0x14f   :  { %v207_v26 = vadd.f32 %v578_v24, %v206_v25  ;;  %v668_v27 = vpop.f32.mrb[1].mxu0 }
 0x150   :  { %v209_v28 = vpop.f32.mrb[2].mxu0 }
 0x151   :  { %v212_v29 = vmax.f32 %v207_v26, 0.0  ;;  %v669_v30 = vpop.f32.mrb[3].mxu0 }
 0x153   :  { %v213_v31 = vpack.c.bf16 %v212_v29, %v212_v29 }
 0x155   :  { %687 = vmatmul.mubr.bf16.vlgmr.msra.gmra.mrb[0].mxu1 %v213_v31 }
 0x156   :  { %726 = vmatprep.mubr.msk.bf16.mxu1 %vm924_vm0, %v923_v0  ;;  %711 = vmatpush3.bf16.msra.mxu1 %v764_v34 }
 0x157   :  { %712 = vmatprep.subr.bf16.mxu1 %v923_v0 }
 0x15a   :  { %713 = vmatpush3.bf16.msra.mxu1 %v765_v35 }
 0x15b   :  { %714 = vmatprep.subr.bf16.mxu1 %v923_v0 }
 0x15e   :  { %715 = vmatpush3.bf16.msra.mxu1 %v766_v36 }
 0x15f   :  { %716 = vmatprep.subr.bf16.mxu1 %v923_v0 }
 0x162   :  { %717 = vmatpush3.bf16.msra.mxu1 %v767_v37 }
 0x163   :  { %718 = vmatprep.subr.bf16.mxu1 %v923_v0 }
 0x166   :  { %719 = vmatpush3.bf16.msra.mxu1 %v768_v38 }
 0x167   :  { %720 = vmatprep.subr.bf16.mxu1 %v923_v0 }
 0x16a   :  { %721 = vmatpush3.bf16.msra.mxu1 %v769_v39 }
 0x16b   :  { %722 = vmatprep.subr.bf16.mxu1 %v923_v0 }
 0x16e   :  { %723 = vmatpush3.bf16.msra.mxu1 %v770_v48 }
 0x16f   :  { %724 = vmatprep.subr.bf16.mxu1 %v923_v0 }
 0x172   :  { %725 = vmatpush3.bf16.msra.mxu1 %v771_v49 }
 0x228   :  { %v319_v41 = vpop.f32.mrb[0].mxu1 }
 0x229   :  { %v320_v42 = vadd.f32 %v587_v40, %v319_v41  ;;  %v688_v43 = vpop.f32.mrb[1].mxu1 }
 0x22a   :  { %v322_v44 = vpop.f32.mrb[2].mxu1 }
 0x22b   :  { %v325_v45 = vmax.f32 %v320_v42, 0.0  ;;  %v689_v46 = vpop.f32.mrb[3].mxu1 }
 0x22d   :  { %v326_v47 = vpack.c.bf16 %v325_v45, %v325_v45 }
 0x22f   :  { %707 = vmatmul.mubr.bf16.vlgmr.msra.gmra.mrb[4].mxu0 %v326_v47 }
 0x302   :  { %v432_v51 = vpop.f32.mrb[4].mxu0 }
 0x303   :  { %v433_v52 = vadd.f32 %v596_v50, %v432_v51  ;;  %v708_v53 = vpop.f32.mrb[5].mxu0 }
 0x304   :  { %v435_v54 = vpop.f32.mrb[6].mxu0 }
 0x305   :  { %v438_v55 = vmax.f32 %v433_v52, 0.0  ;;  %v709_v56 = vpop.f32.mrb[7].mxu0 }
 0x307   :  { %v439_v57 = vpack.c.bf16 %v438_v55, %v438_v55 }
 0x309   :  { %727 = vmatmul.mubr.bf16.vlgmr.msra.gmra.mrb[4].mxu1 %v439_v57 }
 0x3dc   :  { %v545_v59 = vpop.f32.mrb[4].mxu1 }
 0x3dd   :  { %v546_v60 = vadd.f32 %v605_v58, %v545_v59  ;;  %v728_v61 = vpop.f32.mrb[5].mxu1 }
 0x3de   :  { %v548_v62 = vpop.f32.mrb[6].mxu1 }
 0x3df   :  { %551 = vmax.xlane.f32.xlu0 %v546_v60  ;;  %v729_v63 = vpop.f32.mrb[7].mxu1 }
 0x46c   :  { %v552_v0 = vpop.xlane.xlu0 %551 }
 0x46d   :  { %v553_v1 = vsub.f32 %v546_v60, %v552_v0 }
 0x46f   :  { %v554_v2 = vmul.f32 1.442695, %v553_v1 }
 0x471   :  { %772 = vpow2.f32 %v554_v2 }
 0x47b   :  { %v773_v3 = vpop.eup %772 }
 0x47c   :  { %556 = vadd.xlane.f32.xlu0 %v773_v3 }
 0x509   :  { %v557_v4 = vpop.xlane.xlu0 %556 }
 0x50a   :  { %774 = vrcp.f32 %v557_v4 }
 0x514   :  { %v775_v5 = vpop.eup %774 }
 0x515   :  { %v559_v6 = vmul.f32 %v775_v5, %v773_v3 }
 0x517   :  { %560 = vst [vmem:[#allocation11] sm:$0xff] %v559_v6 }
 0x518   :  { %897 = shalt.err (!%p894_p2)
}
 0x519   :  { %s898_s1 = scalar_lea.hbm %s1121_s9, 128 }
 0x51a   :  { %p899_p3 = scmp.ne.s32.totalorder %s1121_s9, %s898_s1  ;;  %p902_p4 = scmp.lt.u32.totalorder %s898_s1, %s1121_s9 }
 0x51c   :  { %p904_p5 = pnand %p902_p4, %p899_p3 }
 0x51e   :  { %907 = shalt.err (!%p904_p5)
}
 0x51f   :  { %570 = dma.vmem_to_hbm [thread:$0]  %s568_s11, 128, %s1121_s9, [#allocation4]  }
 0x520   :  { %914 = dma.done.wait [#allocation4], 128  }
 0x521   :  { %915 = vsyncadd [#allocation4], 4294967168 }
 0x522   :  { %574 = vsyncpa [#allocation3], 1 }
 0x523   :  { %575 = vsyncpa [#allocation6], 1 }
 0x524   :  { %576 = vsyncpa [#allocation9], 1 }
 0x525   :  { %577 = vsyncpa [#allocation4], 1 }

// kernel: tpu_custom_call.1
= control target key start
LH: loop header
LB: loop body
LE: loop exit
PB: predicated region body
PF: predicated region fallthrough
CT: control target
= control target key end

     0   :  { %14 = vsyncpa [#allocation3], 0  ;;  %s1112_s0 = inlined_call_operand.hbm [shape: bf16[8,128], index: 0, kind: input, shape index: {}]   ;;  %s1113_s1 = inlined_call_operand.hbm [shape: bf16[128,128], index: 1, kind: input, shape index: {}]   ;;  %s1114_s2 = inlined_call_operand.vmem [shape: f32[1,128], index: 2, kind: input, shape index: {}]   ;;  %s1115_s3 = inlined_call_operand.hbm [shape: bf16[128,128], index: 3, kind: input, shape index: {}]   ;;  %s1116_s4 = inlined_call_operand.vmem [shape: f32[1,128], index: 4, kind: input, shape index: {}]   ;;  %s1117_s5 = inlined_call_operand.hbm [shape: bf16[128,128], index: 5, kind: input, shape index: {}]   ;;  %s1118_s6 = inlined_call_operand.vmem [shape: f32[1,128], index: 6, kind: input, shape index: {}]   ;;  %s1119_s7 = inlined_call_operand.hbm [shape: bf16[128,128], index: 7, kind: input, shape index: {}]   ;;  %s1120_s8 = inlined_call_operand.vmem [shape: f32[1,128], index: 8, kind: input, shape index: {}]   ;;  %s1121_s9 = inlined_call_operand.hbm [shape: f32[8,128], index: 9, kind: output, shape index: {}]  }
   0x1   :  { %15 = vsyncpa [#allocation6], 0 }
   0x2   :  { %16 = vsyncpa [#allocation9], 0 }
   0x3   :  { %17 = vsyncpa [#allocation4], 0  ;;  %s916_s30 = smov [#allocation5]   ;;  %s776_s13 = scalar_lea.hbm %s1113_s1, 1024 }
   0x4   :  { %s33_s10 = sshll.u32 %s916_s30, 4  ;;  %p777_p0 = scmp.ne.s32.totalorder %s1113_s1, %s776_s13  ;;  %s34_s10 = int_to_ptr.vmem [resolvable:$true] %s33_s10 }
   0x5   :  { %p780_p1 = scmp.lt.u32.totalorder %s776_s13, %s1113_s1 }
   0x7   :  { %p782_p2 = pnand %p780_p1, %p777_p0 }
   0x9   :  { %785 = shalt.err (!%p782_p2)
}
   0xa   :  { %s786_s18 = scalar_lea.vmem %s34_s10, 1024  ;;  %p791_p4 = scmp.lt.s32.totalorder %s34_s10, %s34_s10 }
   0xb   :  { %p787_p3 = scmp.ne.s32.totalorder %s34_s10, %s786_s18  ;;  %p792_p5 = scmp.lt.s32.totalorder %s786_s18, %s786_s18 }
   0xd   :  { %p793_p6 = por %p792_p5, %p791_p4 }
   0xf   :  { %p794_p7 = pnand %p793_p6, %p787_p3 }
  0x11   :  { %797 = shalt.err (!%p794_p7)
}
  0x12   :  { %s917_s19 = smov 64   ;;  %s918_s20 = smov 4  }
  0x13   :  { %39 = dma.hbm_to_vmem [thread:$0]  %s1113_s1, 1024, %s34_s10, [#allocation6], %s917_s19, %s917_s19, %s918_s20  }
  0x14   :  { %s919_s23 = smov [#allocation8]   ;;  %s920_s25 = smov [#allocation2]  }
  0x15   :  { %s61_s24 = sshll.u32 %s919_s23, 4  ;;  %s24_s26 = sshll.u32 %s920_s25, 4  ;;  %s62_s24 = int_to_ptr.vmem [resolvable:$true] %s61_s24  ;;  %s25_s26 = int_to_ptr.vmem [resolvable:$true] %s24_s26 }
  0x16   :  { %s798_s29 = scalar_lea.hbm %s1117_s5, 1024 }
  0x17   :  { %p799_p8 = scmp.ne.s32.totalorder %s1117_s5, %s798_s29  ;;  %p802_p9 = scmp.lt.u32.totalorder %s798_s29, %s1117_s5 }
  0x19   :  { %p804_p10 = pnand %p802_p9, %p799_p8 }
  0x1b   :  { %807 = shalt.err (!%p804_p10)
}
  0x1c   :  { %s808_s1 = scalar_lea.vmem %s62_s24, 1024  ;;  %p813_p12 = scmp.lt.s32.totalorder %s62_s24, %s62_s24 }
  0x1d   :  { %p809_p11 = scmp.ne.s32.totalorder %s62_s24, %s808_s1  ;;  %p814_p13 = scmp.lt.s32.totalorder %s808_s1, %s808_s1 }
  0x1f   :  { %p815_p0 = por %p814_p13, %p813_p12 }
  0x21   :  { %p816_p1 = pnand %p815_p0, %p809_p11 }
  0x23   :  { %819 = shalt.err (!%p816_p1)
}
  0x24   :  { %67 = dma.hbm_to_vmem [thread:$0]  %s1117_s5, 1024, %s62_s24, [#allocation9], %s917_s19, %s917_s19, %s918_s20  }
  0x25   :  { %s820_s17 = scalar_lea.hbm %s1112_s0, 64 }
  0x26   :  { %p821_p2 = scmp.ne.s32.totalorder %s1112_s0, %s820_s17  ;;  %p824_p3 = scmp.lt.u32.totalorder %s820_s17, %s1112_s0 }
  0x28   :  { %p826_p4 = pnand %p824_p3, %p821_p2 }
  0x2a   :  { %829 = shalt.err (!%p826_p4)
}
  0x2b   :  { %s830_s25 = scalar_lea.vmem %s25_s26, 64  ;;  %p835_p6 = scmp.lt.s32.totalorder %s25_s26, %s25_s26 }
  0x2c   :  { %p831_p5 = scmp.ne.s32.totalorder %s25_s26, %s830_s25  ;;  %p836_p7 = scmp.lt.s32.totalorder %s830_s25, %s830_s25 }
  0x2e   :  { %p837_p8 = por %p836_p7, %p835_p6 }
  0x30   :  { %p838_p9 = pnand %p837_p8, %p831_p5 }
  0x32   :  { %841 = shalt.err (!%p838_p9)
}
  0x33   :  { %27 = dma.hbm_to_vmem [thread:$0]  %s1112_s0, 64, %s25_s26, [#allocation3]  }
  0x34   :  { %s921_s27 = smov [#allocation7]   ;;  %s922_s29 = smov [#allocation10]  }
  0x35   :  { %s47_s28 = sshll.u32 %s921_s27, 4  ;;  %s75_s30 = sshll.u32 %s922_s29, 4  ;;  %s48_s28 = int_to_ptr.vmem [resolvable:$true] %s47_s28  ;;  %s76_s30 = int_to_ptr.vmem [resolvable:$true] %s75_s30 }
  0x36   :  { %s842_s13 = scalar_lea.hbm %s1115_s3, 1024 }
  0x37   :  { %p843_p10 = scmp.ne.s32.totalorder %s1115_s3, %s842_s13  ;;  %p846_p11 = scmp.lt.u32.totalorder %s842_s13, %s1115_s3 }
  0x39   :  { %p848_p12 = pnand %p846_p11, %p843_p10 }
  0x3b   :  { %851 = shalt.err (!%p848_p12)
}
  0x3c   :  { %s852_s0 = scalar_lea.vmem %s48_s28, 1024  ;;  %p857_p0 = scmp.lt.s32.totalorder %s48_s28, %s48_s28 }
  0x3d   :  { %p853_p13 = scmp.ne.s32.totalorder %s48_s28, %s852_s0  ;;  %p858_p1 = scmp.lt.s32.totalorder %s852_s0, %s852_s0 }
  0x3f   :  { %p859_p2 = por %p858_p1, %p857_p0 }
  0x41   :  { %p860_p3 = pnand %p859_p2, %p853_p13 }
  0x43   :  { %863 = shalt.err (!%p860_p3)
}
  0x44   :  { %53 = dma.hbm_to_vmem [thread:$0]  %s1115_s3, 1024, %s48_s28, [#allocation6], %s917_s19, %s917_s19, %s918_s20  }
  0x45   :  { %s864_s21 = scalar_lea.hbm %s1119_s7, 1024 }
  0x46   :  { %p865_p4 = scmp.ne.s32.totalorder %s1119_s7, %s864_s21  ;;  %p868_p5 = scmp.lt.u32.totalorder %s864_s21, %s1119_s7 }
  0x48   :  { %p870_p6 = pnand %p868_p5, %p865_p4 }
  0x4a   :  { %873 = shalt.err (!%p870_p6)
}
  0x4b   :  { %s874_s24 = scalar_lea.vmem %s76_s30, 1024  ;;  %p879_p8 = scmp.lt.s32.totalorder %s76_s30, %s76_s30 }
  0x4c   :  { %p875_p7 = scmp.ne.s32.totalorder %s76_s30, %s874_s24  ;;  %p880_p9 = scmp.lt.s32.totalorder %s874_s24, %s874_s24 }
  0x4e   :  { %p881_p10 = por %p880_p9, %p879_p8 }
  0x50   :  { %p882_p11 = pnand %p881_p10, %p875_p7 }
  0x52   :  { %885 = shalt.err (!%p882_p11)
}
  0x53   :  { %81 = dma.hbm_to_vmem [thread:$0]  %s1119_s7, 1024, %s76_s30, [#allocation9], %s917_s19, %s917_s19, %s918_s20  }
  0x54   :  { %908 = dma.done.wait [#allocation3], 64  }
  0x55   :  { %909 = vsyncadd [#allocation3], 4294967232 }
  0x56   :  { %910 = dma.done.wait [#allocation6], 2048  }
  0x57   :  { %911 = vsyncadd [#allocation6], 4294965248 }
  0x58   :  { %912 = dma.done.wait [#allocation9], 2048  }
  0x59   :  { %913 = vsyncadd [#allocation9], 4294965248  ;;  %v923_v0 = vmov 0.0   ;;  %vm924_vm0 = vmmov 0   ;;  %v740_v1 = vld [vmem:[#allocation5] sm:$0xff]   ;;  %v741_v2 = vld [vmem:[#allocation5 + $0x8] sm:$0xff]  }
  0x5a   :  { %650 = vmatprep.subr.bf16.mxu0 %v923_v0  ;;  %666 = vmatprep.mubr.msk.bf16.mxu0 %vm924_vm0, %v923_v0  ;;  %v742_v3 = vld [vmem:[#allocation5 + $0x10] sm:$0xff]   ;;  %v748_v4 = vld [vmem:[#allocation7] sm:$0xff]   ;;  %v743_v5 = vld [vmem:[#allocation5 + $0x18] sm:$0xff]  }
  0x5b   :  { %670 = vmatprep.subr.bf16.mxu1 %v923_v0  ;;  %686 = vmatprep.mubr.msk.bf16.mxu1 %vm924_vm0, %v923_v0  ;;  %v749_v6 = vld [vmem:[#allocation7 + $0x8] sm:$0xff]   ;;  %v744_v7 = vld [vmem:[#allocation5 + $0x20] sm:$0xff]   ;;  %v750_v8 = vld [vmem:[#allocation7 + $0x10] sm:$0xff]  }
  0x5c   :  { %651 = vmatpush3.bf16.msra.mxu0 %v740_v1  ;;  %671 = vmatpush3.bf16.msra.mxu1 %v748_v4  ;;  %v745_v9 = vld [vmem:[#allocation5 + $0x28] sm:$0xff]   ;;  %v751_v10 = vld [vmem:[#allocation7 + $0x18] sm:$0xff]   ;;  %v746_v11 = vld [vmem:[#allocation5 + $0x30] sm:$0xff]  }
  0x5d   :  { %652 = vmatprep.subr.bf16.mxu0 %v923_v0  ;;  %672 = vmatprep.subr.bf16.mxu1 %v923_v0  ;;  %v752_v12 = vld [vmem:[#allocation7 + $0x20] sm:$0xff]   ;;  %v747_v13 = vld [vmem:[#allocation5 + $0x38] sm:$0xff]   ;;  %v753_v14 = vld [vmem:[#allocation7 + $0x28] sm:$0xff]  }
  0x5e   :  { %v100_v15 = vld [vmem:[#allocation2] sm:$0xf]  ;;  %v754_v16 = vld [vmem:[#allocation7 + $0x30] sm:$0xff]   ;;  %v756_v18 = vld [vmem:[#allocation8] sm:$0xff]  }
  0x5f   :  { %v755_v17 = vld [vmem:[#allocation7 + $0x38] sm:$0xff]   ;;  %v757_v19 = vld [vmem:[#allocation8 + $0x8] sm:$0xff]   ;;  %v758_v20 = vld [vmem:[#allocation8 + $0x10] sm:$0xff]  }
  0x60   :  { %653 = vmatpush3.bf16.msra.mxu0 %v741_v2  ;;  %673 = vmatpush3.bf16.msra.mxu1 %v749_v6  ;;  %v759_v21 = vld [vmem:[#allocation8 + $0x18] sm:$0xff]   ;;  %v760_v22 = vld [vmem:[#allocation8 + $0x20] sm:$0xff]   ;;  %v761_v23 = vld [vmem:[#allocation8 + $0x28] sm:$0xff]  }
  0x61   :  { %654 = vmatprep.subr.bf16.mxu0 %v923_v0  ;;  %674 = vmatprep.subr.bf16.mxu1 %v923_v0  ;;  %v578_v24 = vld [vmem:[%s1114_s2] ss:$0 sm:$0xff]  ;;  %v762_v32 = vld [vmem:[#allocation8 + $0x30] sm:$0xff]   ;;  %v764_v34 = vld [vmem:[#allocation10] sm:$0xff]  }
  0x62   :  { %v763_v33 = vld [vmem:[#allocation8 + $0x38] sm:$0xff]   ;;  %v765_v35 = vld [vmem:[#allocation10 + $0x8] sm:$0xff]   ;;  %v766_v36 = vld [vmem:[#allocation10 + $0x10] sm:$0xff]  }
  0x63   :  { %v767_v37 = vld [vmem:[#allocation10 + $0x18] sm:$0xff]   ;;  %v768_v38 = vld [vmem:[#allocation10 + $0x20] sm:$0xff]   ;;  %v769_v39 = vld [vmem:[#allocation10 + $0x28] sm:$0xff]  }
  0x64   :  { %655 = vmatpush3.bf16.msra.mxu0 %v742_v3  ;;  %675 = vmatpush3.bf16.msra.mxu1 %v750_v8  ;;  %v587_v40 = vld [vmem:[%s1116_s4] ss:$0 sm:$0xff]  ;;  %v770_v48 = vld [vmem:[#allocation10 + $0x30] sm:$0xff]  }
  0x65   :  { %656 = vmatprep.subr.bf16.mxu0 %v923_v0  ;;  %676 = vmatprep.subr.bf16.mxu1 %v923_v0  ;;  %v771_v49 = vld [vmem:[#allocation10 + $0x38] sm:$0xff]  }
  0x66   :  { %v596_v50 = vld [vmem:[%s1118_s6] ss:$0 sm:$0xff]  ;;  %s925_s6 = smov [#allocation11]  }
  0x67   :  { %v605_v58 = vld [vmem:[%s1120_s8] ss:$0 sm:$0xff]  ;;  %s567_s11 = sshll.u32 %s925_s6, 4  ;;  %s568_s11 = int_to_ptr.vmem [resolvable:$true] %s567_s11 }
  0x68   :  { %657 = vmatpush3.bf16.msra.mxu0 %v743_v5  ;;  %677 = vmatpush3.bf16.msra.mxu1 %v751_v10  ;;  %s886_s8 = scalar_lea.vmem %s568_s11, 128  ;;  %p891_p13 = scmp.lt.s32.totalorder %s568_s11, %s568_s11 }
  0x69   :  { %658 = vmatprep.subr.bf16.mxu0 %v923_v0  ;;  %678 = vmatprep.subr.bf16.mxu1 %v923_v0  ;;  %p887_p12 = scmp.ne.s32.totalorder %s568_s11, %s886_s8  ;;  %p892_p0 = scmp.lt.s32.totalorder %s886_s8, %s886_s8 }
  0x6b   :  { %p893_p1 = por %p892_p0, %p891_p13 }
  0x6c   :  { %659 = vmatpush3.bf16.msra.mxu0 %v744_v7  ;;  %679 = vmatpush3.bf16.msra.mxu1 %v752_v12 }
  0x6d   :  { %660 = vmatprep.subr.bf16.mxu0 %v923_v0  ;;  %680 = vmatprep.subr.bf16.mxu1 %v923_v0  ;;  %p894_p2 = pnand %p893_p1, %p887_p12 }
  0x70   :  { %661 = vmatpush3.bf16.msra.mxu0 %v745_v9  ;;  %681 = vmatpush3.bf16.msra.mxu1 %v753_v14 }
  0x71   :  { %662 = vmatprep.subr.bf16.mxu0 %v923_v0  ;;  %682 = vmatprep.subr.bf16.mxu1 %v923_v0 }
  0x74   :  { %663 = vmatpush3.bf16.msra.mxu0 %v746_v11  ;;  %683 = vmatpush3.bf16.msra.mxu1 %v754_v16 }
  0x75   :  { %664 = vmatprep.subr.bf16.mxu0 %v923_v0  ;;  %684 = vmatprep.subr.bf16.mxu1 %v923_v0 }
  0x78   :  { %665 = vmatpush3.bf16.msra.mxu0 %v747_v13  ;;  %685 = vmatpush3.bf16.msra.mxu1 %v755_v17 }
  0x79   :  { %690 = vmatprep.subr.bf16.mxu0 %v923_v0  ;;  %710 = vmatprep.subr.bf16.mxu1 %v923_v0 }
  0x7b   :  { %667 = vmatmul.mubr.bf16.vlgmr.msra.gmra.mrb[0].mxu0 %v100_v15 }
  0x7c   :  { %706 = vmatprep.mubr.msk.bf16.mxu0 %vm924_vm0, %v923_v0  ;;  %691 = vmatpush3.bf16.msra.mxu0 %v756_v18 }
  0x7d   :  { %692 = vmatprep.subr.bf16.mxu0 %v923_v0 }
  0x80   :  { %693 = vmatpush3.bf16.msra.mxu0 %v757_v19 }
  0x81   :  { %694 = vmatprep.subr.bf16.mxu0 %v923_v0 }
  0x84   :  { %695 = vmatpush3.bf16.msra.mxu0 %v758_v20 }
  0x85   :  { %696 = vmatprep.subr.bf16.mxu0 %v923_v0 }
  0x88   :  { %697 = vmatpush3.bf16.msra.mxu0 %v759_v21 }
  0x89   :  { %698 = vmatprep.subr.bf16.mxu0 %v923_v0 }
  0x8c   :  { %699 = vmatpush3.bf16.msra.mxu0 %v760_v22 }
  0x8d   :  { %700 = vmatprep.subr.bf16.mxu0 %v923_v0 }
  0x90   :  { %701 = vmatpush3.bf16.msra.mxu0 %v761_v23 }
  0x91   :  { %702 = vmatprep.subr.bf16.mxu0 %v923_v0 }
  0x94   :  { %703 = vmatpush3.bf16.msra.mxu0 %v762_v32 }
  0x95   :  { %704 = vmatprep.subr.bf16.mxu0 %v923_v0 }
  0x98   :  { %705 = vmatpush3.bf16.msra.mxu0 %v763_v33 }
 0x14e   :  { %v206_v25 = vpop.f32.mrb[0].mxu0 }
 0x14f   :  { %v207_v26 = vadd.f32 %v578_v24, %v206_v25  ;;  %v668_v27 = vpop.f32.mrb[1].mxu0 }
 0x150   :  { %v209_v28 = vpop.f32.mrb[2].mxu0 }
 0x151   :  { %v212_v29 = vmax.f32 %v207_v26, 0.0  ;;  %v669_v30 = vpop.f32.mrb[3].mxu0 }
 0x153   :  { %v213_v31 = vpack.c.bf16 %v212_v29, %v212_v29 }
 0x155   :  { %687 = vmatmul.mubr.bf16.vlgmr.msra.gmra.mrb[0].mxu1 %v213_v31 }
 0x156   :  { %726 = vmatprep.mubr.msk.bf16.mxu1 %vm924_vm0, %v923_v0  ;;  %711 = vmatpush3.bf16.msra.mxu1 %v764_v34 }
 0x157   :  { %712 = vmatprep.subr.bf16.mxu1 %v923_v0 }
 0x15a   :  { %713 = vmatpush3.bf16.msra.mxu1 %v765_v35 }
 0x15b   :  { %714 = vmatprep.subr.bf16.mxu1 %v923_v0 }
 0x15e   :  { %715 = vmatpush3.bf16.msra.mxu1 %v766_v36 }
 0x15f   :  { %716 = vmatprep.subr.bf16.mxu1 %v923_v0 }
 0x162   :  { %717 = vmatpush3.bf16.msra.mxu1 %v767_v37 }
 0x163   :  { %718 = vmatprep.subr.bf16.mxu1 %v923_v0 }
 0x166   :  { %719 = vmatpush3.bf16.msra.mxu1 %v768_v38 }
 0x167   :  { %720 = vmatprep.subr.bf16.mxu1 %v923_v0 }
 0x16a   :  { %721 = vmatpush3.bf16.msra.mxu1 %v769_v39 }
 0x16b   :  { %722 = vmatprep.subr.bf16.mxu1 %v923_v0 }
 0x16e   :  { %723 = vmatpush3.bf16.msra.mxu1 %v770_v48 }
 0x16f   :  { %724 = vmatprep.subr.bf16.mxu1 %v923_v0 }
 0x172   :  { %725 = vmatpush3.bf16.msra.mxu1 %v771_v49 }
 0x228   :  { %v319_v41 = vpop.f32.mrb[0].mxu1 }
 0x229   :  { %v320_v42 = vadd.f32 %v587_v40, %v319_v41  ;;  %v688_v43 = vpop.f32.mrb[1].mxu1 }
 0x22a   :  { %v322_v44 = vpop.f32.mrb[2].mxu1 }
 0x22b   :  { %v325_v45 = vmax.f32 %v320_v42, 0.0  ;;  %v689_v46 = vpop.f32.mrb[3].mxu1 }
 0x22d   :  { %v326_v47 = vpack.c.bf16 %v325_v45, %v325_v45 }
 0x22f   :  { %707 = vmatmul.mubr.bf16.vlgmr.msra.gmra.mrb[4].mxu0 %v326_v47 }
 0x302   :  { %v432_v51 = vpop.f32.mrb[4].mxu0 }
 0x303   :  { %v433_v52 = vadd.f32 %v596_v50, %v432_v51  ;;  %v708_v53 = vpop.f32.mrb[5].mxu0 }
 0x304   :  { %v435_v54 = vpop.f32.mrb[6].mxu0 }
 0x305   :  { %v438_v55 = vmax.f32 %v433_v52, 0.0  ;;  %v709_v56 = vpop.f32.mrb[7].mxu0 }
 0x307   :  { %v439_v57 = vpack.c.bf16 %v438_v55, %v438_v55 }
 0x309   :  { %727 = vmatmul.mubr.bf16.vlgmr.msra.gmra.mrb[4].mxu1 %v439_v57 }
 0x3dc   :  { %v545_v59 = vpop.f32.mrb[4].mxu1 }
 0x3dd   :  { %v546_v60 = vadd.f32 %v605_v58, %v545_v59  ;;  %v728_v61 = vpop.f32.mrb[5].mxu1 }
 0x3de   :  { %v548_v62 = vpop.f32.mrb[6].mxu1 }
 0x3df   :  { %551 = vmax.xlane.f32.xlu0 %v546_v60  ;;  %v729_v63 = vpop.f32.mrb[7].mxu1 }
 0x46c   :  { %v552_v0 = vpop.xlane.xlu0 %551 }
 0x46d   :  { %v553_v1 = vsub.f32 %v546_v60, %v552_v0 }
 0x46f   :  { %v554_v2 = vmul.f32 1.442695, %v553_v1 }
 0x471   :  { %772 = vpow2.f32 %v554_v2 }
 0x47b   :  { %v773_v3 = vpop.eup %772 }
 0x47c   :  { %556 = vadd.xlane.f32.xlu0 %v773_v3 }
 0x509   :  { %v557_v4 = vpop.xlane.xlu0 %556 }
 0x50a   :  { %774 = vrcp.f32 %v557_v4 }
 0x514   :  { %v775_v5 = vpop.eup %774 }
 0x515   :  { %v559_v6 = vmul.f32 %v775_v5, %v773_v3 }
 0x517   :  { %560 = vst [vmem:[#allocation11] sm:$0xff] %v559_v6 }
 0x518   :  { %897 = shalt.err (!%p894_p2)
}
 0x519   :  { %s898_s1 = scalar_lea.hbm %s1121_s9, 128 }
 0x51a   :  { %p899_p3 = scmp.ne.s32.totalorder %s1121_s9, %s898_s1  ;;  %p902_p4 = scmp.lt.u32.totalorder %s898_s1, %s1121_s9 }
 0x51c   :  { %p904_p5 = pnand %p902_p4, %p899_p3 }
 0x51e   :  { %907 = shalt.err (!%p904_p5)
}
 0x51f   :  { %570 = dma.vmem_to_hbm [thread:$0]  %s568_s11, 128, %s1121_s9, [#allocation4]  }
 0x520   :  { %914 = dma.done.wait [#allocation4], 128  }
 0x521   :  { %915 = vsyncadd [#allocation4], 4294967168 }
 0x522   :  { %574 = vsyncpa [#allocation3], 1 }
 0x523   :  { %575 = vsyncpa [#allocation6], 1 }
 0x524   :  { %576 = vsyncpa [#allocation9], 1 }
 0x525   :  { %577 = vsyncpa [#allocation4], 1 }

</bundles_post_ra>
